<compile_context>
chip_gen: v6e
topology: v6e:2x2x1
jax: 0.10.0
libtpu: 0.0.40
codegen_flags: <defaults>
</compile_context>

<pallas_src>
import functools
import math

import jax
import jax.numpy as jnp
from jax.experimental import pallas as pl
from jax.experimental.pallas import tpu as pltpu

LANE = 128      # vreg lane width
SUBLANE = 8     # f32 sublane width


def _round_up(x, m):
    return ((x + m - 1) // m) * m


# ----------------------------------------------------------------------------
# Fused Pallas kernel: (n_layers x (Linear + ReLU)) + final fc, one block.
# ----------------------------------------------------------------------------
def _fused_mlp_kernel(*refs, n_mat):
    """refs = (x_ref, w0, b0, w1, b1, ..., w_fc, b_fc, o_ref).

    Weights are bf16 (zero lane-padded); activation is cast to bf16 right
    before each matmul; accumulation / bias add / ReLU stay in f32."""
    x_ref = refs[0]
    o_ref = refs[-1]
    wb = refs[1:-1]

    h = x_ref[...].astype(jnp.bfloat16)               # (bb, Din) bf16
    for l in range(n_mat):                            # static unrolled chain
        w = wb[2 * l][...]                            # (Dl, Dl1_pad) bf16
        b = wb[2 * l + 1][...]                        # (1, Dl1_pad)  f32
        acc = jnp.dot(h, w, preferred_element_type=jnp.float32) + b
        if l < n_mat - 1:
            acc = jnp.maximum(acc, 0.0)               # hidden layers: ReLU (f32)
            h = acc.astype(jnp.bfloat16)              # bf16 inter-layer activation
        else:
            h = acc
        # nn.Dropout layers are identity at inference -> omitted.
    o_ref[...] = h.astype(o_ref.dtype)                # bf16 writeback


# ----------------------------------------------------------------------------
# Wrapper: single fused pallas_call over batch tiles, slice result.
# ----------------------------------------------------------------------------
def mlp_forward(params, x, node_feat_size, *, block_b=512):
    # --- flatten exactly like MLP.forward ---
    if node_feat_size == 1:
        x = jnp.squeeze(x, -1)                               # torch.squeeze(x, -1)
    else:
        x = x.reshape(x.shape[0], x.shape[1] * x.shape[2])   # x.view(B, N*F)
    x = x.astype(jnp.float32)
    B, Din = x.shape

    # --- collect layer (W, b) pairs: hidden layers + final fc ---
    wb_list = list(params["layers"]) + [params["fc"]]
    n_mat = len(wb_list)
    n_classes = wb_list[-1][0].shape[1]

    # --- feature dims: keep the TRUE input dim (x is passed unpadded);
    #     lane-pad every produced dim to a multiple of 128 (zero pad == exact)
    dims = [Din] + [w.shape[1] for (w, _) in wb_list]
    dims_pad = [Din] + [_round_up(d, LANE) for d in dims[1:]]

    padded_wb = []
    for l, (w, b) in enumerate(wb_list):
        din_p, dout_p = dims_pad[l], dims_pad[l + 1]
        w_p = jnp.zeros((din_p, dout_p), jnp.bfloat16)
        w_p = w_p.at[: w.shape[0], : w.shape[1]].set(w.astype(jnp.bfloat16))
        b_p = jnp.zeros((1, dout_p), jnp.float32)
        b_p = b_p.at[0, : b.shape[0]].set(b.astype(jnp.float32))
        padded_wb += [w_p, b_p]

    # --- batch tile: grow with B, cap for VMEM sanity, keep >=2 grid steps
    #     when possible so the parallel axis can shard across v7x's 2 TCs.
    bb = min(max(block_b, _round_up(B // 8, SUBLANE)), 2048)
    bb = min(bb, _round_up(B, SUBLANE))
    if B > SUBLANE and pl.cdiv(B, bb) < 2:
        bb = _round_up(pl.cdiv(B, 2), SUBLANE)
    grid = (pl.cdiv(B, bb),)

    in_specs = [pl.BlockSpec((bb, Din), lambda i: (i, 0))]
    for l in range(n_mat):
        din_p, dout_p = dims_pad[l], dims_pad[l + 1]
        # weights/biases: whole (tiny) array, constant index_map -> resident
        # in VMEM and never re-fetched across grid steps.
        in_specs.append(pl.BlockSpec((din_p, dout_p), lambda i: (0, 0)))
        in_specs.append(pl.BlockSpec((1, dout_p), lambda i: (0, 0)))
    out_spec = pl.BlockSpec((bb, dims_pad[-1]), lambda i: (i, 0))

    # --- advisory cost estimate from TRUE dims / actual dtypes ---
    flops = 2 * B * sum(dims[l] * dims[l + 1] for l in range(n_mat))
    bytes_accessed = (
        4 * B * Din                                            # x read (f32)
        + sum(2 * int(w.size) + 4 * int(b.size) for (w, b) in wb_list)
        + 2 * B * n_classes                                    # logits (bf16)
    )

    kernel = functools.partial(_fused_mlp_kernel, n_mat=n_mat)
    out_p = pl.pallas_call(
        kernel,
        out_shape=jax.ShapeDtypeStruct((B, dims_pad[-1]), jnp.bfloat16),
        grid=grid,
        in_specs=in_specs,
        out_specs=out_spec,
        compiler_params=pltpu.CompilerParams(
            dimension_semantics=("parallel",),
        ),
        cost_estimate=pl.CostEstimate(
            flops=flops, transcendentals=0, bytes_accessed=bytes_accessed
        ),
    )(x, *padded_wb)

    # slice the real logits out of the lane-padded bf16 block, return f32
    return out_p[:, :n_classes].astype(jnp.float32)


# ----------------------------------------------------------------------------
# Parameter init (deterministic, PyTorch-Linear-style uniform bounds)
# ----------------------------------------------------------------------------
def init_linear_params(key, in_dim, out_dim):
    kw, kb = jax.random.split(key)
    bound = 1.0 / math.sqrt(in_dim)
    w = jax.random.uniform(kw, (in_dim, out_dim), jnp.float32, -bound, bound)
    b = jax.random.uniform(kb, (out_dim,), jnp.float32, -bound, bound)
    return w, b


def init_mlp_params(key, in_dim, hidden_dim, n_classes, n_layers):
    feat_list = [in_dim] + [hidden_dim] * n_layers
    params = {"layers": [], "fc": None}
    keys = jax.random.split(key, n_layers + 1)
    for l_idx in range(n_layers):
        params["layers"].append(
            init_linear_params(keys[l_idx], feat_list[l_idx], feat_list[l_idx + 1])
        )
    params["fc"] = init_linear_params(keys[-1], feat_list[-1], n_classes)
    return params


# ----------------------------------------------------------------------------
# Pure-JAX f32 reference (for correctness check)
# ----------------------------------------------------------------------------
def mlp_forward_ref(params, x, node_feat_size):
    if node_feat_size == 1:
        x = jnp.squeeze(x, -1)
    else:
        x = x.reshape(x.shape[0], x.shape[1] * x.shape[2])
    h = x
    for w, b in params["layers"]:
        h = jnp.maximum(h @ w + b, 0.0)
    w_fc, b_fc = params["fc"]
    return h @ w_fc + b_fc


# ----------------------------------------------------------------------------
if __name__ == "__main__":
    # config analogous to the PyTorch module (use_bn=False branch)
    config = {
        "model_name": "MLP",
        "net_params": {
            "node_feat_size": 4,
            "n_graph_nodes": 16,
            "hidden_dim": 32,
            "num_out_classes": 2,
            "in_feat_dropout": 0.0,
            "dropout": 0.0,
            "num_layers": 2,
            "use_bn": False,  # TODO(synk): BatchNorm branch not implemented (unused here)
        },
    }
    np_ = config["net_params"]
    node_feat_size = np_["node_feat_size"]
    in_dim = np_["n_graph_nodes"] * node_feat_size
    hidden_dim = np_["hidden_dim"]
    n_classes = np_["num_out_classes"]
    n_layers = np_["num_layers"]

    key = jax.random.PRNGKey(0)
    k_param, k_x = jax.random.split(key)

    params = init_mlp_params(k_param, in_dim, hidden_dim, n_classes, n_layers)

    batch = 8
    x = jax.random.normal(
        k_x, (batch, np_["n_graph_nodes"], node_feat_size), jnp.float32
    )

    logits = mlp_forward(params, x, node_feat_size)
    logits = jax.block_until_ready(logits)

    assert logits.shape == (batch, n_classes), logits.shape
    assert bool(jnp.all(jnp.isfinite(logits)))

    # bf16 matmul operands -> compare against the f32 reference with a
    # bf16-appropriate tolerance.
    ref = mlp_forward_ref(params, x, node_feat_size)
    assert bool(jnp.allclose(logits, ref, atol=3e-2, rtol=3e-2)), (
        float(jnp.max(jnp.abs(logits - ref)))
    )

    print("KERNEL_OK")
</pallas_src>

<mosaic_0001>
module attributes {stable_mosaic.version = 11 : i64} {
  func.func @_fused_mlp_kernel(%arg0: i32, %arg1: memref<8x64xf32, #tpu.memory_space<vmem>>, %arg2: memref<64x128xbf16, #tpu.memory_space<vmem>>, %arg3: memref<1x128xf32, #tpu.memory_space<vmem>>, %arg4: memref<128x128xbf16, #tpu.memory_space<vmem>>, %arg5: memref<1x128xf32, #tpu.memory_space<vmem>>, %arg6: memref<128x128xbf16, #tpu.memory_space<vmem>>, %arg7: memref<1x128xf32, #tpu.memory_space<vmem>>, %arg8: memref<8x128xbf16, #tpu.memory_space<vmem>>) attributes {dimension_semantics = [#tpu.dimension_semantics<parallel>], iteration_bounds = array<i64: 1>, scalar_prefetch = 0 : i64, scratch_operands = 0 : i64, tpu.core_type = #tpu.core_type<tc>, window_params = [{transform_indices = @transform_0, window_bounds = array<i64: 8, 64>}, {pipeline_mode = #tpu.pipeline_mode<synchronous>, transform_indices = @transform_1, window_bounds = array<i64: 64, 128>}, {pipeline_mode = #tpu.pipeline_mode<synchronous>, transform_indices = @transform_2, window_bounds = array<i64: 1, 128>}, {pipeline_mode = #tpu.pipeline_mode<synchronous>, transform_indices = @transform_3, window_bounds = array<i64: 128, 128>}, {pipeline_mode = #tpu.pipeline_mode<synchronous>, transform_indices = @transform_4, window_bounds = array<i64: 1, 128>}, {pipeline_mode = #tpu.pipeline_mode<synchronous>, transform_indices = @transform_5, window_bounds = array<i64: 128, 128>}, {pipeline_mode = #tpu.pipeline_mode<synchronous>, transform_indices = @transform_6, window_bounds = array<i64: 1, 128>}, {transform_indices = @transform_7, window_bounds = array<i64: 8, 128>}]} {
    %c0 = arith.constant 0 : index
    %c0_0 = arith.constant 0 : index
    %0 = vector.load %arg1[%c0, %c0_0] : memref<8x64xf32, #tpu.memory_space<vmem>>, vector<8x64xf32>
    %1 = arith.truncf %0 : vector<8x64xf32> to vector<8x64xbf16>
    %c0_1 = arith.constant 0 : index
    %c0_2 = arith.constant 0 : index
    %2 = vector.load %arg2[%c0_1, %c0_2] : memref<64x128xbf16, #tpu.memory_space<vmem>>, vector<64x128xbf16>
    %c0_3 = arith.constant 0 : index
    %c0_4 = arith.constant 0 : index
    %3 = vector.load %arg3[%c0_3, %c0_4] : memref<1x128xf32, #tpu.memory_space<vmem>>, vector<1x128xf32>
    %cst = arith.constant dense<0.000000e+00> : vector<8x128xf32>
    %4 = tpu.matmul %1, %2, %cst {dimension_numbers = #tpu.dot_dimension_numbers<[1], [0], [0], [1], [0, 0, 1, 1], [], []>} : vector<8x64xbf16>, vector<64x128xbf16>, vector<8x128xf32> -> vector<8x128xf32>
    %5 = vector.broadcast %3 : vector<1x128xf32> to vector<8x128xf32>
    %6 = arith.addf %4, %5 : vector<8x128xf32>
    %cst_5 = arith.constant 0.000000e+00 : f32
    %7 = vector.broadcast %cst_5 : f32 to vector<8x128xf32>
    %8 = arith.maximumf %6, %7 : vector<8x128xf32>
    %9 = arith.truncf %8 : vector<8x128xf32> to vector<8x128xbf16>
    %c0_6 = arith.constant 0 : index
    %c0_7 = arith.constant 0 : index
    %10 = vector.load %arg4[%c0_6, %c0_7] : memref<128x128xbf16, #tpu.memory_space<vmem>>, vector<128x128xbf16>
    %c0_8 = arith.constant 0 : index
    %c0_9 = arith.constant 0 : index
    %11 = vector.load %arg5[%c0_8, %c0_9] : memref<1x128xf32, #tpu.memory_space<vmem>>, vector<1x128xf32>
    %cst_10 = arith.constant dense<0.000000e+00> : vector<8x128xf32>
    %12 = tpu.matmul %9, %10, %cst_10 {dimension_numbers = #tpu.dot_dimension_numbers<[1], [0], [0], [1], [0, 0, 1, 1], [], []>} : vector<8x128xbf16>, vector<128x128xbf16>, vector<8x128xf32> -> vector<8x128xf32>
    %13 = vector.broadcast %11 : vector<1x128xf32> to vector<8x128xf32>
    %14 = arith.addf %12, %13 : vector<8x128xf32>
    %cst_11 = arith.constant 0.000000e+00 : f32
    %15 = vector.broadcast %cst_11 : f32 to vector<8x128xf32>
    %16 = arith.maximumf %14, %15 : vector<8x128xf32>
    %17 = arith.truncf %16 : vector<8x128xf32> to vector<8x128xbf16>
    %c0_12 = arith.constant 0 : index
    %c0_13 = arith.constant 0 : index
    %18 = vector.load %arg6[%c0_12, %c0_13] : memref<128x128xbf16, #tpu.memory_space<vmem>>, vector<128x128xbf16>
    %c0_14 = arith.constant 0 : index
    %c0_15 = arith.constant 0 : index
    %19 = vector.load %arg7[%c0_14, %c0_15] : memref<1x128xf32, #tpu.memory_space<vmem>>, vector<1x128xf32>
    %cst_16 = arith.constant dense<0.000000e+00> : vector<8x128xf32>
    %20 = tpu.matmul %17, %18, %cst_16 {dimension_numbers = #tpu.dot_dimension_numbers<[1], [0], [0], [1], [0, 0, 1, 1], [], []>} : vector<8x128xbf16>, vector<128x128xbf16>, vector<8x128xf32> -> vector<8x128xf32>
    %21 = vector.broadcast %19 : vector<1x128xf32> to vector<8x128xf32>
    %22 = arith.addf %20, %21 : vector<8x128xf32>
    %23 = arith.truncf %22 : vector<8x128xf32> to vector<8x128xbf16>
    %c0_17 = arith.constant 0 : index
    %c0_18 = arith.constant 0 : index
    %24 = vector.load %arg8[%c0_17, %c0_18] : memref<8x128xbf16, #tpu.memory_space<vmem>>, vector<8x128xbf16>
    tpu.vector_store %arg8[%c0_17, %c0_18], %23 {strides = array<i32>} : memref<8x128xbf16, #tpu.memory_space<vmem>>, vector<8x128xbf16>,
    return
  }
  func.func @transform_0(%arg0: i32) -> (i32, i32) {
    %c0_i32 = arith.constant 0 : i32
    %c0_i32_0 = arith.constant 0 : i32
    return %arg0, %c0_i32 : i32, i32
  }
  func.func @transform_1(%arg0: i32) -> (i32, i32) {
    %c0_i32 = arith.constant 0 : i32
    %c0_i32_0 = arith.constant 0 : i32
    %c0_i32_1 = arith.constant 0 : i32
    return %c0_i32, %c0_i32_0 : i32, i32
  }
  func.func @transform_2(%arg0: i32) -> (i32, i32) {
    %c0_i32 = arith.constant 0 : i32
    %c0_i32_0 = arith.constant 0 : i32
    %c0_i32_1 = arith.constant 0 : i32
    return %c0_i32, %c0_i32_0 : i32, i32
  }
  func.func @transform_3(%arg0: i32) -> (i32, i32) {
    %c0_i32 = arith.constant 0 : i32
    %c0_i32_0 = arith.constant 0 : i32
    %c0_i32_1 = arith.constant 0 : i32
    return %c0_i32, %c0_i32_0 : i32, i32
  }
  func.func @transform_4(%arg0: i32) -> (i32, i32) {
    %c0_i32 = arith.constant 0 : i32
    %c0_i32_0 = arith.constant 0 : i32
    %c0_i32_1 = arith.constant 0 : i32
    return %c0_i32, %c0_i32_0 : i32, i32
  }
  func.func @transform_5(%arg0: i32) -> (i32, i32) {
    %c0_i32 = arith.constant 0 : i32
    %c0_i32_0 = arith.constant 0 : i32
    %c0_i32_1 = arith.constant 0 : i32
    return %c0_i32, %c0_i32_0 : i32, i32
  }
  func.func @transform_6(%arg0: i32) -> (i32, i32) {
    %c0_i32 = arith.constant 0 : i32
    %c0_i32_0 = arith.constant 0 : i32
    %c0_i32_1 = arith.constant 0 : i32
    return %c0_i32, %c0_i32_0 : i32, i32
  }
  func.func @transform_7(%arg0: i32) -> (i32, i32) {
    %c0_i32 = arith.constant 0 : i32
    %c0_i32_0 = arith.constant 0 : i32
    return %arg0, %c0_i32 : i32, i32
  }
}

</mosaic_0001>

<bundles_post_ra>
// kernel: tpu_custom_call.1
= control target key start
LH: loop header
LB: loop body
LE: loop exit
PB: predicated region body
PF: predicated region fallthrough
CT: control target
= control target key end

     0   :  { %12 = vsyncpa [#allocation3], 0  ;;  %s755_s0 = inlined_call_operand.hbm [shape: f32[8,64], index: 0, kind: input, shape index: {}]   ;;  %s756_s1 = inlined_call_operand.hbm [shape: bf16[64,128], index: 1, kind: input, shape index: {}]   ;;  %s757_s2 = inlined_call_operand.vmem [shape: f32[1,128], index: 2, kind: input, shape index: {}]   ;;  %s758_s3 = inlined_call_operand.hbm [shape: bf16[128,128], index: 3, kind: input, shape index: {}]   ;;  %s759_s4 = inlined_call_operand.vmem [shape: f32[1,128], index: 4, kind: input, shape index: {}]   ;;  %s760_s5 = inlined_call_operand.hbm [shape: bf16[128,128], index: 5, kind: input, shape index: {}]   ;;  %s761_s6 = inlined_call_operand.vmem [shape: f32[1,128], index: 6, kind: input, shape index: {}]   ;;  %s762_s7 = inlined_call_operand.hbm [shape: bf16[8,128], index: 7, kind: output, shape index: {}]  }
   0x1   :  { %13 = vsyncpa [#allocation6], 0 }
   0x2   :  { %14 = vsyncpa [#allocation9], 0 }
   0x3   :  { %15 = vsyncpa [#allocation4], 0  ;;  %s647_s24 = smov [#allocation5]  }
   0x4   :  { %s31_s25 = sshll.u32 %s647_s24, 4  ;;  %s32_s25 = int_to_ptr.vmem [resolvable:$true] %s31_s25 }
   0x5   :  { %s547_s26 = scalar_lea.vmem %s32_s25, 512  ;;  %p552_p1 = scmp.lt.s32.totalorder %s32_s25, %s32_s25 }
   0x6   :  { %p548_p0 = scmp.ne.s32.totalorder %s32_s25, %s547_s26  ;;  %p553_p2 = scmp.lt.s32.totalorder %s547_s26, %s547_s26 }
   0x8   :  { %p554_p3 = por %p553_p2, %p552_p1 }
   0xa   :  { %p555_p4 = pnand %p554_p3, %p548_p0 }
   0xc   :  { %558 = shalt.err (!%p555_p4)
}
   0xd   :  { %s648_s27 = smov 64   ;;  %s649_s28 = smov 4  }
   0xe   :  { %37 = dma.hbm_to_vmem [thread:$0]  %s756_s1, 512, %s32_s25, [#allocation6], %s648_s27, %s648_s27, %s649_s28  }
   0xf   :  { %s650_s8 = smov [#allocation2]   ;;  %s651_s10 = smov [#allocation7]  }
  0x10   :  { %s22_s9 = sshll.u32 %s650_s8, 4  ;;  %s45_s11 = sshll.u32 %s651_s10, 4  ;;  %s23_s9 = int_to_ptr.vmem [resolvable:$true] %s22_s9  ;;  %s46_s11 = int_to_ptr.vmem [resolvable:$true] %s45_s11 }
  0x11   :  { %s567_s12 = scalar_lea.vmem %s23_s9, 128  ;;  %p572_p6 = scmp.lt.s32.totalorder %s23_s9, %s23_s9 }
  0x12   :  { %p568_p5 = scmp.ne.s32.totalorder %s23_s9, %s567_s12  ;;  %p573_p7 = scmp.lt.s32.totalorder %s567_s12, %s567_s12 }
  0x14   :  { %p574_p8 = por %p573_p7, %p572_p6 }
  0x16   :  { %p575_p9 = pnand %p574_p8, %p568_p5 }
  0x18   :  { %578 = shalt.err (!%p575_p9)
}
  0x19   :  { %25 = dma.hbm_to_vmem [thread:$0]  %s755_s0, 128, %s23_s9, [#allocation3]  }
  0x1a   :  { %s587_s15 = scalar_lea.vmem %s46_s11, 1024  ;;  %p592_p11 = scmp.lt.s32.totalorder %s46_s11, %s46_s11 }
  0x1b   :  { %p588_p10 = scmp.ne.s32.totalorder %s46_s11, %s587_s15  ;;  %p593_p12 = scmp.lt.s32.totalorder %s587_s15, %s587_s15 }
  0x1d   :  { %p594_p13 = por %p593_p12, %p592_p11 }
  0x1f   :  { %p595_p0 = pnand %p594_p13, %p588_p10 }
  0x21   :  { %598 = shalt.err (!%p595_p0)
}
  0x22   :  { %51 = dma.hbm_to_vmem [thread:$0]  %s758_s3, 1024, %s46_s11, [#allocation6], %s648_s27, %s648_s27, %s649_s28  }
  0x23   :  { %s652_s17 = smov [#allocation8]  }
  0x24   :  { %s59_s18 = sshll.u32 %s652_s17, 4  ;;  %s60_s18 = int_to_ptr.vmem [resolvable:$true] %s59_s18 }
  0x25   :  { %s607_s19 = scalar_lea.vmem %s60_s18, 1024  ;;  %p612_p2 = scmp.lt.s32.totalorder %s60_s18, %s60_s18 }
  0x26   :  { %p608_p1 = scmp.ne.s32.totalorder %s60_s18, %s607_s19  ;;  %p613_p3 = scmp.lt.s32.totalorder %s607_s19, %s607_s19 }
  0x28   :  { %p614_p4 = por %p613_p3, %p612_p2 }
  0x2a   :  { %p615_p5 = pnand %p614_p4, %p608_p1 }
  0x2c   :  { %618 = shalt.err (!%p615_p5)
}
  0x2d   :  { %65 = dma.hbm_to_vmem [thread:$0]  %s760_s5, 1024, %s60_s18, [#allocation9], %s648_s27, %s648_s27, %s649_s28  }
  0x2e   :  { %639 = dma.done.wait [#allocation3], 128  }
  0x2f   :  { %640 = vsyncadd [#allocation3], 4294967168 }
  0x30   :  { %641 = dma.done.wait [#allocation6], 1536  }
  0x31   :  { %642 = vsyncadd [#allocation6], 4294965760 }
  0x32   :  { %643 = dma.done.wait [#allocation9], 1024  }
  0x33   :  { %644 = vsyncadd [#allocation9], 4294966272  ;;  %v653_v0 = vmov 0.0   ;;  %vm654_vm0 = vmmov 0   ;;  %v519_v1 = vld [vmem:[#allocation5 + $0x18] sm:$0xff]   ;;  %v520_v2 = vld [vmem:[#allocation5 + $0x10] sm:$0xff]  }
  0x34   :  { %458 = vmatprep.subr.bf16.mxu0 %v653_v0  ;;  %466 = vmatprep.mubr.msk.bf16.mxu0 %vm654_vm0, %v653_v0  ;;  %v523_v3 = vld [vmem:[#allocation7 + $0x38] sm:$0xff]   ;;  %v521_v4 = vld [vmem:[#allocation5 + $0x8] sm:$0xff]   ;;  %v524_v5 = vld [vmem:[#allocation7 + $0x30] sm:$0xff]   ;;  %vm122_vm1 = vcmask 523264   ;;  %s655_s24 = smov [#allocation10]  }
  0x35   :  { %470 = vmatprep.subr.bf16.mxu1 %v653_v0  ;;  %486 = vmatprep.mubr.msk.bf16.mxu1 %vm654_vm0, %v653_v0  ;;  %v522_v6 = vld [vmem:[#allocation5] sm:$0xff]   ;;  %v81_v7 = vld [vmem:[#allocation2] sm:$0xff]  ;;  %v525_v8 = vld [vmem:[#allocation7 + $0x28] sm:$0xff]   ;;  %s400_s25 = sshll.u32 %s655_s24, 4  ;;  %s401_s25 = int_to_ptr.vmem [resolvable:$true] %s400_s25 }
  0x36   :  { %459 = vmatpush3.bf16.msra.mxu0 %v519_v1  ;;  %471 = vmatpush3.bf16.msra.mxu1 %v523_v3  ;;  %v82_v9 = vpack.c.bf16 %v81_v7, %v81_v7  ;;  %v526_v10 = vld [vmem:[#allocation7 + $0x20] sm:$0xff]   ;;  %v527_v11 = vld [vmem:[#allocation7 + $0x18] sm:$0xff]   ;;  %v528_v12 = vld [vmem:[#allocation7 + $0x10] sm:$0xff]   ;;  %p624_p7 = scmp.lt.s32.totalorder %s401_s25, %s401_s25 }
  0x37   :  { %460 = vmatprep.subr.bf16.mxu0 %v653_v0  ;;  %472 = vmatprep.subr.bf16.mxu1 %v653_v0  ;;  %v529_v13 = vld [vmem:[#allocation7 + $0x8] sm:$0xff]   ;;  %v530_v14 = vld [vmem:[#allocation7] sm:$0xff]   ;;  %v531_v15 = vld [vmem:[#allocation8 + $0x38] sm:$0xff]  }
  0x38   :  { %v532_v16 = vld [vmem:[#allocation8 + $0x30] sm:$0xff]   ;;  %v533_v17 = vld [vmem:[#allocation8 + $0x28] sm:$0xff]   ;;  %v534_v18 = vld [vmem:[#allocation8 + $0x20] sm:$0xff]  }
  0x39   :  { %v535_v19 = vld [vmem:[#allocation8 + $0x18] sm:$0xff]   ;;  %v536_v20 = vld [vmem:[#allocation8 + $0x10] sm:$0xff]   ;;  %v537_v29 = vld [vmem:[#allocation8 + $0x8] sm:$0xff]  }
  0x3a   :  { %461 = vmatpush3.bf16.msra.mxu0 %v520_v2  ;;  %473 = vmatpush3.bf16.msra.mxu1 %v524_v5  ;;  %v411_v21 = vld [vmem:[%s757_s2] ss:$0 sm:$0xff]  ;;  %v538_v30 = vld [vmem:[#allocation8] sm:$0xff]  }
  0x3b   :  { %462 = vmatprep.subr.bf16.mxu0 %v653_v0  ;;  %474 = vmatprep.subr.bf16.mxu1 %v653_v0  ;;  %v417_v31 = vld [vmem:[%s759_s4] ss:$0 sm:$0xff]  ;;  %s619_s4 = scalar_lea.vmem %s401_s25, 64 }
  0x3c   :  { %v426_v39 = vld [vmem:[%s761_s6] ss:$0 sm:$0xff]  ;;  %p620_p6 = scmp.ne.s32.totalorder %s401_s25, %s619_s4  ;;  %p625_p8 = scmp.lt.s32.totalorder %s619_s4, %s619_s4 }
  0x3e   :  { %463 = vmatpush3.bf16.msra.mxu0 %v521_v4  ;;  %475 = vmatpush3.bf16.msra.mxu1 %v525_v8  ;;  %p626_p9 = por %p625_p8, %p624_p7 }
  0x3f   :  { %464 = vmatprep.subr.bf16.mxu0 %v653_v0  ;;  %476 = vmatprep.subr.bf16.mxu1 %v653_v0 }
  0x40   :  { %p627_p10 = pnand %p626_p9, %p620_p6 }
  0x42   :  { %465 = vmatpush3.bf16.msra.mxu0 %v522_v6  ;;  %477 = vmatpush3.bf16.msra.mxu1 %v526_v10 }
  0x43   :  { %490 = vmatprep.subr.bf16.mxu0 %v653_v0  ;;  %478 = vmatprep.subr.bf16.mxu1 %v653_v0 }
  0x45   :  { %467 = vmatmul.mubr.msk.bf16.vlgmr.msra.gmra.mxu0 %vm122_vm1, %v82_v9 }
  0x46   :  { %506 = vmatprep.mubr.msk.bf16.mxu0 %vm654_vm0, %v653_v0  ;;  %479 = vmatpush3.bf16.msra.mxu1 %v527_v11 }
  0x47   :  { %480 = vmatprep.subr.bf16.mxu1 %v653_v0  ;;  %491 = vmatpush3.bf16.msra.mxu0 %v531_v15 }
  0x48   :  { %492 = vmatprep.subr.bf16.mxu0 %v653_v0 }
  0x4a   :  { %481 = vmatpush3.bf16.msra.mxu1 %v528_v12 }
  0x4b   :  { %482 = vmatprep.subr.bf16.mxu1 %v653_v0  ;;  %493 = vmatpush3.bf16.msra.mxu0 %v532_v16 }
  0x4c   :  { %494 = vmatprep.subr.bf16.mxu0 %v653_v0 }
  0x4e   :  { %483 = vmatpush3.bf16.msra.mxu1 %v529_v13 }
  0x4f   :  { %484 = vmatprep.subr.bf16.mxu1 %v653_v0  ;;  %495 = vmatpush3.bf16.msra.mxu0 %v533_v17 }
  0x50   :  { %496 = vmatprep.subr.bf16.mxu0 %v653_v0 }
  0x52   :  { %485 = vmatpush3.bf16.msra.mxu1 %v530_v14 }
  0x53   :  { %497 = vmatpush3.bf16.msra.mxu0 %v534_v18 }
  0x54   :  { %498 = vmatprep.subr.bf16.mxu0 %v653_v0 }
  0x57   :  { %499 = vmatpush3.bf16.msra.mxu0 %v535_v19 }
  0x58   :  { %500 = vmatprep.subr.bf16.mxu0 %v653_v0 }
  0x5b   :  { %501 = vmatpush3.bf16.msra.mxu0 %v536_v20 }
  0x5c   :  { %502 = vmatprep.subr.bf16.mxu0 %v653_v0 }
  0x5f   :  { %503 = vmatpush3.bf16.msra.mxu0 %v537_v29 }
  0x60   :  { %504 = vmatprep.subr.bf16.mxu0 %v653_v0 }
  0x63   :  { %505 = vmatpush3.bf16.msra.mxu0 %v538_v30 }
 0x105   :  { %v160_v22 = vpop.f32.mrf.mxu0 }
 0x106   :  { %v161_v23 = vadd.f32 %v411_v21, %v160_v22 }
 0x107   :  { %v468_v24 = vpop.f32.mrf.mxu0 }
 0x108   :  { %v166_v25 = vmax.f32 %v161_v23, 0.0 }
 0x109   :  { %v163_v26 = vpop.f32.mrf.mxu0 }
 0x10a   :  { %v167_v27 = vpack.c.bf16 %v166_v25, %v166_v25 }
 0x10b   :  { %v469_v28 = vpop.f32.mrf.mxu0 }
 0x10c   :  { %487 = vmatmul.mubr.bf16.vlgmr.msra.gmra.mxu1 %v167_v27 }
 0x1cc   :  { %v273_v32 = vpop.f32.mrf.mxu1 }
 0x1cd   :  { %v274_v33 = vadd.f32 %v417_v31, %v273_v32 }
 0x1ce   :  { %v488_v34 = vpop.f32.mrf.mxu1 }
 0x1cf   :  { %v279_v35 = vmax.f32 %v274_v33, 0.0 }
 0x1d0   :  { %v276_v36 = vpop.f32.mrf.mxu1 }
 0x1d1   :  { %v280_v37 = vpack.c.bf16 %v279_v35, %v279_v35 }
 0x1d2   :  { %v489_v38 = vpop.f32.mrf.mxu1 }
 0x1d3   :  { %507 = vmatmul.mubr.bf16.vlgmr.msra.gmra.mxu0 %v280_v37 }
 0x293   :  { %v386_v40 = vpop.f32.mrf.mxu0 }
 0x294   :  { %v387_v41 = vadd.f32 %v426_v39, %v386_v40 }
 0x295   :  { %v508_v42 = vpop.f32.mrf.mxu0 }
 0x296   :  { %v392_v43 = vpack.c.bf16 %v387_v41, %v387_v41 }
 0x297   :  { %v389_v44 = vpop.f32.mrf.mxu0 }
 0x298   :  { %393 = vst [vmem:[#allocation10] sm:$0xf] %v392_v43 }
 0x299   :  { %v509_v45 = vpop.f32.mrf.mxu0 }
 0x29a   :  { %630 = shalt.err (!%p627_p10)
}
 0x29b   :  { %403 = dma.vmem_to_hbm [thread:$0]  %s401_s25, 64, %s762_s7, [#allocation4]  }
 0x29c   :  { %645 = dma.done.wait [#allocation4], 64  }
 0x29d   :  { %646 = vsyncadd [#allocation4], 4294967232 }
 0x29e   :  { %407 = vsyncpa [#allocation3], 1 }
 0x29f   :  { %408 = vsyncpa [#allocation6], 1 }
 0x2a0   :  { %409 = vsyncpa [#allocation9], 1 }
 0x2a1   :  { %410 = vsyncpa [#allocation4], 1 }

</bundles_post_ra>
